<compile_context>
chip_gen: v5e
topology: v5e:2x2
jax: 0.10.0
libtpu: 0.0.40
codegen_flags: <defaults>
</compile_context>

<pallas_src>
import functools

import jax
import jax.numpy as jnp
import numpy as np
from jax.experimental import pallas as pl
from jax.experimental.pallas import tpu as pltpu

# 64 x 4096 f32 activation slab = 1 MiB per live value; with lane-dense
# (3, TB) / (2, TB) streams the double-buffered DMA footprint per step is a
# few hundred KiB -- well inside v7x's 32 MiB default scoped VMEM.
_MAX_TILE_B = 4096


def _mlp_kernel(xt_ref,
                w1_ref, b1_ref,
                w2_ref, b2_ref,
                w3_ref, b3_ref,
                w4_ref, b4_ref,
                w5_ref, b5_ref,
                out_ref):
    xt = xt_ref[...]                       # [in_dim, TB] f32, batch on lanes

    # ---- layer 1 on the VPU (K = in_dim = 3, too shallow for the MXU):
    #      h[H, TB] = W1^T @ [x; t] + b1, as in_dim broadcast FMAs.
    w1 = w1_ref[...]                       # [H, in_dim] f32 (hoisted once)
    h = b1_ref[...] + w1[:, 0:1] * xt[0:1, :]
    for j in range(1, w1.shape[1]):        # static unroll, in_dim == 3
        h = h + w1[:, j:j + 1] * xt[j:j + 1, :]
    h = jnp.maximum(h, 0.0)

    # ---- layers 2..4: W^T @ h on the MXU (operands may be bf16, f32
    #      accumulation); bias-add + ReLU stay f32 on the VPU.
    for w_ref, b_ref in ((w2_ref, b2_ref), (w3_ref, b3_ref), (w4_ref, b4_ref)):
        w = w_ref[...]                     # [H, H] (f32 or bf16)
        b = b_ref[...]                     # [H, 1] f32
        h = jnp.maximum(
            jnp.dot(w, h.astype(w.dtype),
                    preferred_element_type=jnp.float32) + b,
            0.0)

    # ---- output layer (no activation): [out_dim, TB], lane-dense store.
    w5 = w5_ref[...]                       # [out_dim, H]
    out = jnp.dot(w5, h.astype(w5.dtype),
                  preferred_element_type=jnp.float32) + b5_ref[...]
    out_ref[...] = out.astype(out_ref.dtype)


def _pick_tile_b(batch):
    """Lane-aligned batch tile giving an even, >=4-step grid for big batches
    (keeps v7x's two TensorCores balanced and the DMA pipeline busy)."""
    if batch <= 1024:
        return batch                                 # single full block
    min_steps = -(-batch // _MAX_TILE_B)             # ceil
    n_steps = max(4, 2 * (-(-min_steps // 2)))       # even, >= 4
    tile = -(-batch // n_steps)                      # ceil
    tile = -(-tile // 128) * 128                     # lane-aligned
    return min(tile, _MAX_TILE_B)


@functools.partial(jax.jit, static_argnames=("use_bf16_mxu",))
def diffusion_mlp_forward(x, t, params, use_bf16_mxu=True):
    B, in_x = x.shape
    hidden = params["w1t"].shape[0]
    out_dim = params["w5t"].shape[0]
    in_dim = in_x + 1

    # Fuse [x, t] into one feature-major slab (in_dim, B): batch on lanes.
    xt = jnp.concatenate(
        [x.astype(jnp.float32), t.reshape(B, 1).astype(jnp.float32)],
        axis=1).T

    # Layer 1 stays f32 (VPU); layers 2-5 optionally feed the MXU in bf16
    # (f32 accumulate) -- the native fast path on v6e/v7x, MXU-only on v5e.
    mx_dtype = jnp.bfloat16 if use_bf16_mxu else jnp.float32
    weights = (params["w1t"].astype(jnp.float32), params["b1"],
               params["w2t"].astype(mx_dtype), params["b2"],
               params["w3t"].astype(mx_dtype), params["b3"],
               params["w4t"].astype(mx_dtype), params["b4"],
               params["w5t"].astype(mx_dtype), params["b5"])

    tile_b = _pick_tile_b(B)
    grid = (pl.cdiv(B, tile_b),)

    def batch_spec(feat):
        # Feature dim on sublanes (== full array dim), batch tile on lanes.
        return pl.BlockSpec((feat, tile_b), lambda i: (0, i))

    def resident_spec(arr):
        # Constant index_map -> weight/bias stays VMEM-resident across steps.
        return pl.BlockSpec(arr.shape, lambda i: (0, 0))

    in_specs = [batch_spec(in_dim)] + [resident_spec(a) for a in weights]

    flops = 2 * B * (in_dim * hidden + 3 * hidden * hidden + hidden * out_dim)
    param_bytes = sum(int(a.size) * a.dtype.itemsize for a in weights)
    bytes_accessed = int(xt.size) * 4 + B * out_dim * 4 + param_bytes

    out_fm = pl.pallas_call(
        _mlp_kernel,
        out_shape=jax.ShapeDtypeStruct((out_dim, B), jnp.float32),
        grid=grid,
        in_specs=in_specs,
        out_specs=batch_spec(out_dim),
        compiler_params=pltpu.CompilerParams(
            dimension_semantics=("parallel",)),
        cost_estimate=pl.CostEstimate(
            flops=flops, transcendentals=0, bytes_accessed=bytes_accessed),
    )(xt, *weights)

    return out_fm.T                         # back to (B, out_dim)


def init_params(key, input_dim=3, hidden_dim=64, output_dim=2):
    """torch.nn.Linear-style U(-1/sqrt(fan_in), 1/sqrt(fan_in)) init.

    Weights are stored in torch's (out_features, in_features) layout, which is
    exactly the feature-major W^T the kernel consumes; biases as (out, 1).
    """
    keys = jax.random.split(key, 10)
    dims = [(input_dim, hidden_dim), (hidden_dim, hidden_dim),
            (hidden_dim, hidden_dim), (hidden_dim, hidden_dim),
            (hidden_dim, output_dim)]
    params = {}
    for i, (din, dout) in enumerate(dims, start=1):
        bound = 1.0 / np.sqrt(din)
        params[f"w{i}t"] = jax.random.uniform(keys[2 * (i - 1)], (dout, din),
                                              jnp.float32, -bound, bound)
        params[f"b{i}"] = jax.random.uniform(keys[2 * i - 1], (dout, 1),
                                             jnp.float32, -bound, bound)
    return params


def diffusion_mlp_ref(x, t, params):
    # Faithful to the PyTorch module: concat([x, t.unsqueeze(1)]) -> MLP.
    h = jnp.concatenate([x, t[:, None]], axis=1)
    for i in range(1, 5):
        h = jnp.maximum(h @ params[f"w{i}t"].T + params[f"b{i}"].T, 0.0)
    return h @ params["w5t"].T + params["b5"].T


if __name__ == "__main__":
    key = jax.random.PRNGKey(0)
    kx, kt, kp, kx2, kt2 = jax.random.split(key, 5)

    params = init_params(kp, input_dim=3, hidden_dim=64, output_dim=2)

    # Small-shape check (2-D samples + per-sample diffusion timestep).
    B = 8
    x = jax.random.normal(kx, (B, 2), jnp.float32)
    t = jax.random.uniform(kt, (B,), jnp.float32)
    ref = diffusion_mlp_ref(x, t, params)

    out_f32 = jax.block_until_ready(
        diffusion_mlp_forward(x, t, params, use_bf16_mxu=False))
    np.testing.assert_allclose(np.asarray(out_f32), np.asarray(ref),
                               rtol=1e-5, atol=1e-5)

    out_bf16 = jax.block_until_ready(
        diffusion_mlp_forward(x, t, params, use_bf16_mxu=True))
    np.testing.assert_allclose(np.asarray(out_bf16), np.asarray(ref),
                               rtol=2e-2, atol=2e-2)

    # Larger batch exercises the tiled / pipelined path: even 4-step grid
    # (tile 1152) with a masked, lane-dense tail block (4136 = 3*1152 + 680).
    B2 = 4096 + 40
    x2 = jax.random.normal(kx2, (B2, 2), jnp.float32)
    t2 = jax.random.uniform(kt2, (B2,), jnp.float32)
    ref2 = diffusion_mlp_ref(x2, t2, params)

    out2_f32 = jax.block_until_ready(
        diffusion_mlp_forward(x2, t2, params, use_bf16_mxu=False))
    np.testing.assert_allclose(np.asarray(out2_f32), np.asarray(ref2),
                               rtol=1e-5, atol=1e-5)

    out2_bf16 = jax.block_until_ready(
        diffusion_mlp_forward(x2, t2, params, use_bf16_mxu=True))
    np.testing.assert_allclose(np.asarray(out2_bf16), np.asarray(ref2),
                               rtol=2e-2, atol=2e-2)

    print("KERNEL_OK")
</pallas_src>

<mosaic_0001>
module attributes {stable_mosaic.version = 11 : i64} {
  func.func @_mlp_kernel(%arg0: i32, %arg1: memref<3x8xf32, #tpu.memory_space<vmem>>, %arg2: memref<64x3xf32, #tpu.memory_space<vmem>>, %arg3: memref<64x1xf32, #tpu.memory_space<vmem>>, %arg4: memref<64x64xf32, #tpu.memory_space<vmem>>, %arg5: memref<64x1xf32, #tpu.memory_space<vmem>>, %arg6: memref<64x64xf32, #tpu.memory_space<vmem>>, %arg7: memref<64x1xf32, #tpu.memory_space<vmem>>, %arg8: memref<64x64xf32, #tpu.memory_space<vmem>>, %arg9: memref<64x1xf32, #tpu.memory_space<vmem>>, %arg10: memref<2x64xf32, #tpu.memory_space<vmem>>, %arg11: memref<2x1xf32, #tpu.memory_space<vmem>>, %arg12: memref<2x8xf32, #tpu.memory_space<vmem>>) attributes {dimension_semantics = [#tpu.dimension_semantics<parallel>], iteration_bounds = array<i64: 1>, scalar_prefetch = 0 : i64, scratch_operands = 0 : i64, tpu.core_type = #tpu.core_type<tc>, window_params = [{transform_indices = @transform_0, window_bounds = array<i64: 3, 8>}, {pipeline_mode = #tpu.pipeline_mode<synchronous>, transform_indices = @transform_1, window_bounds = array<i64: 64, 3>}, {pipeline_mode = #tpu.pipeline_mode<synchronous>, transform_indices = @transform_2, window_bounds = array<i64: 64, 1>}, {pipeline_mode = #tpu.pipeline_mode<synchronous>, transform_indices = @transform_3, window_bounds = array<i64: 64, 64>}, {pipeline_mode = #tpu.pipeline_mode<synchronous>, transform_indices = @transform_4, window_bounds = array<i64: 64, 1>}, {pipeline_mode = #tpu.pipeline_mode<synchronous>, transform_indices = @transform_5, window_bounds = array<i64: 64, 64>}, {pipeline_mode = #tpu.pipeline_mode<synchronous>, transform_indices = @transform_6, window_bounds = array<i64: 64, 1>}, {pipeline_mode = #tpu.pipeline_mode<synchronous>, transform_indices = @transform_7, window_bounds = array<i64: 64, 64>}, {pipeline_mode = #tpu.pipeline_mode<synchronous>, transform_indices = @transform_8, window_bounds = array<i64: 64, 1>}, {pipeline_mode = #tpu.pipeline_mode<synchronous>, transform_indices = @transform_9, window_bounds = array<i64: 2, 64>}, {pipeline_mode = #tpu.pipeline_mode<synchronous>, transform_indices = @transform_10, window_bounds = array<i64: 2, 1>}, {transform_indices = @transform_11, window_bounds = array<i64: 2, 8>}]} {
    %c0 = arith.constant 0 : index
    %c0_0 = arith.constant 0 : index
    %0 = vector.load %arg1[%c0, %c0_0] : memref<3x8xf32, #tpu.memory_space<vmem>>, vector<3x8xf32>
    %c0_1 = arith.constant 0 : index
    %c0_2 = arith.constant 0 : index
    %1 = vector.load %arg2[%c0_1, %c0_2] : memref<64x3xf32, #tpu.memory_space<vmem>>, vector<64x3xf32>
    %c0_3 = arith.constant 0 : index
    %c0_4 = arith.constant 0 : index
    %2 = vector.load %arg3[%c0_3, %c0_4] : memref<64x1xf32, #tpu.memory_space<vmem>>, vector<64x1xf32>
    %3 = vector.extract_strided_slice %1 {offsets = [0, 0], sizes = [64, 1], strides = [1, 1]} : vector<64x3xf32> to vector<64x1xf32>
    %4 = vector.extract_strided_slice %0 {offsets = [0, 0], sizes = [1, 8], strides = [1, 1]} : vector<3x8xf32> to vector<1x8xf32>
    %5 = vector.broadcast %3 : vector<64x1xf32> to vector<64x8xf32>
    %6 = vector.broadcast %4 : vector<1x8xf32> to vector<64x8xf32>
    %7 = arith.mulf %5, %6 : vector<64x8xf32>
    %8 = vector.broadcast %2 : vector<64x1xf32> to vector<64x8xf32>
    %9 = arith.addf %8, %7 : vector<64x8xf32>
    %10 = vector.extract_strided_slice %1 {offsets = [0, 1], sizes = [64, 1], strides = [1, 1]} : vector<64x3xf32> to vector<64x1xf32>
    %11 = vector.extract_strided_slice %0 {offsets = [1, 0], sizes = [1, 8], strides = [1, 1]} : vector<3x8xf32> to vector<1x8xf32>
    %12 = vector.broadcast %10 : vector<64x1xf32> to vector<64x8xf32>
    %13 = vector.broadcast %11 : vector<1x8xf32> to vector<64x8xf32>
    %14 = arith.mulf %12, %13 : vector<64x8xf32>
    %15 = arith.addf %9, %14 : vector<64x8xf32>
    %16 = vector.extract_strided_slice %1 {offsets = [0, 2], sizes = [64, 1], strides = [1, 1]} : vector<64x3xf32> to vector<64x1xf32>
    %17 = vector.extract_strided_slice %0 {offsets = [2, 0], sizes = [1, 8], strides = [1, 1]} : vector<3x8xf32> to vector<1x8xf32>
    %18 = vector.broadcast %16 : vector<64x1xf32> to vector<64x8xf32>
    %19 = vector.broadcast %17 : vector<1x8xf32> to vector<64x8xf32>
    %20 = arith.mulf %18, %19 : vector<64x8xf32>
    %21 = arith.addf %15, %20 : vector<64x8xf32>
    %cst = arith.constant 0.000000e+00 : f32
    %22 = vector.broadcast %cst : f32 to vector<64x8xf32>
    %23 = arith.maximumf %21, %22 : vector<64x8xf32>
    %c0_5 = arith.constant 0 : index
    %c0_6 = arith.constant 0 : index
    %24 = vector.load %arg4[%c0_5, %c0_6] : memref<64x64xf32, #tpu.memory_space<vmem>>, vector<64x64xf32>
    %c0_7 = arith.constant 0 : index
    %c0_8 = arith.constant 0 : index
    %25 = vector.load %arg5[%c0_7, %c0_8] : memref<64x1xf32, #tpu.memory_space<vmem>>, vector<64x1xf32>
    %cst_9 = arith.constant dense<0.000000e+00> : vector<64x8xf32>
    %26 = tpu.matmul %24, %23, %cst_9 {dimension_numbers = #tpu.dot_dimension_numbers<[1], [0], [0], [1], [0, 0, 1, 1], [], []>} : vector<64x64xf32>, vector<64x8xf32>, vector<64x8xf32> -> vector<64x8xf32>
    %27 = vector.broadcast %25 : vector<64x1xf32> to vector<64x8xf32>
    %28 = arith.addf %26, %27 : vector<64x8xf32>
    %cst_10 = arith.constant 0.000000e+00 : f32
    %29 = vector.broadcast %cst_10 : f32 to vector<64x8xf32>
    %30 = arith.maximumf %28, %29 : vector<64x8xf32>
    %c0_11 = arith.constant 0 : index
    %c0_12 = arith.constant 0 : index
    %31 = vector.load %arg6[%c0_11, %c0_12] : memref<64x64xf32, #tpu.memory_space<vmem>>, vector<64x64xf32>
    %c0_13 = arith.constant 0 : index
    %c0_14 = arith.constant 0 : index
    %32 = vector.load %arg7[%c0_13, %c0_14] : memref<64x1xf32, #tpu.memory_space<vmem>>, vector<64x1xf32>
    %cst_15 = arith.constant dense<0.000000e+00> : vector<64x8xf32>
    %33 = tpu.matmul %31, %30, %cst_15 {dimension_numbers = #tpu.dot_dimension_numbers<[1], [0], [0], [1], [0, 0, 1, 1], [], []>} : vector<64x64xf32>, vector<64x8xf32>, vector<64x8xf32> -> vector<64x8xf32>
    %34 = vector.broadcast %32 : vector<64x1xf32> to vector<64x8xf32>
    %35 = arith.addf %33, %34 : vector<64x8xf32>
    %cst_16 = arith.constant 0.000000e+00 : f32
    %36 = vector.broadcast %cst_16 : f32 to vector<64x8xf32>
    %37 = arith.maximumf %35, %36 : vector<64x8xf32>
    %c0_17 = arith.constant 0 : index
    %c0_18 = arith.constant 0 : index
    %38 = vector.load %arg8[%c0_17, %c0_18] : memref<64x64xf32, #tpu.memory_space<vmem>>, vector<64x64xf32>
    %c0_19 = arith.constant 0 : index
    %c0_20 = arith.constant 0 : index
    %39 = vector.load %arg9[%c0_19, %c0_20] : memref<64x1xf32, #tpu.memory_space<vmem>>, vector<64x1xf32>
    %cst_21 = arith.constant dense<0.000000e+00> : vector<64x8xf32>
    %40 = tpu.matmul %38, %37, %cst_21 {dimension_numbers = #tpu.dot_dimension_numbers<[1], [0], [0], [1], [0, 0, 1, 1], [], []>} : vector<64x64xf32>, vector<64x8xf32>, vector<64x8xf32> -> vector<64x8xf32>
    %41 = vector.broadcast %39 : vector<64x1xf32> to vector<64x8xf32>
    %42 = arith.addf %40, %41 : vector<64x8xf32>
    %cst_22 = arith.constant 0.000000e+00 : f32
    %43 = vector.broadcast %cst_22 : f32 to vector<64x8xf32>
    %44 = arith.maximumf %42, %43 : vector<64x8xf32>
    %c0_23 = arith.constant 0 : index
    %c0_24 = arith.constant 0 : index
    %45 = vector.load %arg10[%c0_23, %c0_24] : memref<2x64xf32, #tpu.memory_space<vmem>>, vector<2x64xf32>
    %cst_25 = arith.constant dense<0.000000e+00> : vector<2x8xf32>
    %46 = tpu.matmul %45, %44, %cst_25 {dimension_numbers = #tpu.dot_dimension_numbers<[1], [0], [0], [1], [0, 0, 1, 1], [], []>} : vector<2x64xf32>, vector<64x8xf32>, vector<2x8xf32> -> vector<2x8xf32>
    %c0_26 = arith.constant 0 : index
    %c0_27 = arith.constant 0 : index
    %47 = vector.load %arg11[%c0_26, %c0_27] : memref<2x1xf32, #tpu.memory_space<vmem>>, vector<2x1xf32>
    %48 = vector.broadcast %47 : vector<2x1xf32> to vector<2x8xf32>
    %49 = arith.addf %46, %48 : vector<2x8xf32>
    %c0_28 = arith.constant 0 : index
    %c0_29 = arith.constant 0 : index
    %50 = vector.load %arg12[%c0_28, %c0_29] : memref<2x8xf32, #tpu.memory_space<vmem>>, vector<2x8xf32>
    tpu.vector_store %arg12[%c0_28, %c0_29], %49 {strides = array<i32>} : memref<2x8xf32, #tpu.memory_space<vmem>>, vector<2x8xf32>,
    return
  }
  func.func @transform_0(%arg0: i32) -> (i32, i32) {
    %c0_i32 = arith.constant 0 : i32
    %c0_i32_0 = arith.constant 0 : i32
    return %c0_i32, %arg0 : i32, i32
  }
  func.func @transform_1(%arg0: i32) -> (i32, i32) {
    %c0_i32 = arith.constant 0 : i32
    %c0_i32_0 = arith.constant 0 : i32
    %c0_i32_1 = arith.constant 0 : i32
    return %c0_i32, %c0_i32_0 : i32, i32
  }
  func.func @transform_2(%arg0: i32) -> (i32, i32) {
    %c0_i32 = arith.constant 0 : i32
    %c0_i32_0 = arith.constant 0 : i32
    %c0_i32_1 = arith.constant 0 : i32
    return %c0_i32, %c0_i32_0 : i32, i32
  }
  func.func @transform_3(%arg0: i32) -> (i32, i32) {
    %c0_i32 = arith.constant 0 : i32
    %c0_i32_0 = arith.constant 0 : i32
    %c0_i32_1 = arith.constant 0 : i32
    return %c0_i32, %c0_i32_0 : i32, i32
  }
  func.func @transform_4(%arg0: i32) -> (i32, i32) {
    %c0_i32 = arith.constant 0 : i32
    %c0_i32_0 = arith.constant 0 : i32
    %c0_i32_1 = arith.constant 0 : i32
    return %c0_i32, %c0_i32_0 : i32, i32
  }
  func.func @transform_5(%arg0: i32) -> (i32, i32) {
    %c0_i32 = arith.constant 0 : i32
    %c0_i32_0 = arith.constant 0 : i32
    %c0_i32_1 = arith.constant 0 : i32
    return %c0_i32, %c0_i32_0 : i32, i32
  }
  func.func @transform_6(%arg0: i32) -> (i32, i32) {
    %c0_i32 = arith.constant 0 : i32
    %c0_i32_0 = arith.constant 0 : i32
    %c0_i32_1 = arith.constant 0 : i32
    return %c0_i32, %c0_i32_0 : i32, i32
  }
  func.func @transform_7(%arg0: i32) -> (i32, i32) {
    %c0_i32 = arith.constant 0 : i32
    %c0_i32_0 = arith.constant 0 : i32
    %c0_i32_1 = arith.constant 0 : i32
    return %c0_i32, %c0_i32_0 : i32, i32
  }
  func.func @transform_8(%arg0: i32) -> (i32, i32) {
    %c0_i32 = arith.constant 0 : i32
    %c0_i32_0 = arith.constant 0 : i32
    %c0_i32_1 = arith.constant 0 : i32
    return %c0_i32, %c0_i32_0 : i32, i32
  }
  func.func @transform_9(%arg0: i32) -> (i32, i32) {
    %c0_i32 = arith.constant 0 : i32
    %c0_i32_0 = arith.constant 0 : i32
    %c0_i32_1 = arith.constant 0 : i32
    return %c0_i32, %c0_i32_0 : i32, i32
  }
  func.func @transform_10(%arg0: i32) -> (i32, i32) {
    %c0_i32 = arith.constant 0 : i32
    %c0_i32_0 = arith.constant 0 : i32
    %c0_i32_1 = arith.constant 0 : i32
    return %c0_i32, %c0_i32_0 : i32, i32
  }
  func.func @transform_11(%arg0: i32) -> (i32, i32) {
    %c0_i32 = arith.constant 0 : i32
    %c0_i32_0 = arith.constant 0 : i32
    return %c0_i32, %arg0 : i32, i32
  }
}

</mosaic_0001>

<bundles_post_ra>
// kernel: diffusion_mlp_forward.1
= control target key start
LH: loop header
LB: loop body
LE: loop exit
PB: predicated region body
PF: predicated region fallthrough
CT: control target
= control target key end

     0   :  { %v775_v3 = vmov 1   ;;  %v776_v4 = vmov 0   ;;  %s1109_s0 = inlined_call_operand.vmem [shape: f32[3,8], index: 0, kind: input, shape index: {}]   ;;  %s1110_s1 = inlined_call_operand.vmem [shape: f32[64,3], index: 1, kind: input, shape index: {}]   ;;  %s1111_s2 = inlined_call_operand.vmem [shape: f32[64,1], index: 2, kind: input, shape index: {}]   ;;  %s1112_s3 = inlined_call_operand.vmem [shape: f32[64,64], index: 3, kind: input, shape index: {}]   ;;  %s1113_s4 = inlined_call_operand.vmem [shape: f32[64,1], index: 4, kind: input, shape index: {}]   ;;  %s1114_s5 = inlined_call_operand.vmem [shape: f32[64,64], index: 5, kind: input, shape index: {}]   ;;  %s1115_s6 = inlined_call_operand.vmem [shape: f32[64,1], index: 6, kind: input, shape index: {}]   ;;  %s1116_s7 = inlined_call_operand.vmem [shape: f32[64,64], index: 7, kind: input, shape index: {}]   ;;  %s1117_s8 = inlined_call_operand.vmem [shape: f32[64,1], index: 8, kind: input, shape index: {}]   ;;  %s1118_s9 = inlined_call_operand.vmem [shape: f32[2,64], index: 9, kind: input, shape index: {}]   ;;  %s1119_s10 = inlined_call_operand.vmem [shape: f32[2,1], index: 10, kind: input, shape index: {}]   ;;  %s1120_s11 = inlined_call_operand.hbm [shape: f32[2,8], index: 11, kind: output, shape index: {}]  }
   0x1   :  { %v55_v0 = vld [vmem:[%s1111_s2 + $0x38] sm:$0xff]  ;;  %v46_v1 = vld [vmem:[%s1110_s1 + $0x30] sm:$0xff]  ;;  %v45_v2 = vld [vmem:[%s1110_s1 + $0x28] sm:$0xff]  ;;  %727 = vset.pattern.permute.xlu0 %v775_v3  ;;  %726 = vset.pattern.permute.xlu2 %v776_v4 }
   0x2   :  { %724 = vset.pattern.permute.xlu1 %v776_v4  ;;  %178 = vperm.xlu0 %727, %v46_v1  }
   0x3   :  { %16 = vsyncpa [#allocation3], 0  ;;  %142 = vperm.xlu1 %724, %v55_v0   ;;  %83 = vperm.xlu2 %726, %v45_v2   ;;  %v54_v5 = vld [vmem:[%s1111_s2 + $0x30] sm:$0xff]  ;;  %v47_v6 = vld [vmem:[%s1110_s1 + $0x38] sm:$0xff]  ;;  %v777_v8 = vmov 2   ;;  %vm315_vm0 = vcmask 523264  }
   0x4   :  { %v44_v7 = vld [vmem:[%s1110_s1 + $0x20] sm:$0xff]  ;;  %v42_v9 = vld [vmem:[%s1110_s1 + $0x10] sm:$0xff]  ;;  %v53_v10 = vld [vmem:[%s1111_s2 + $0x28] sm:$0xff]  ;;  %s778_s30 = smov [#allocation2]   ;;  %s686_s13 = sshll.u32 %s1120_s11, 4  ;;  %vm677_vm1 = vcmask 58368   ;;  %s687_s13 = int_to_ptr.hbm [resolvable:$true] %s686_s13 }
   0x5   :  { %v50_v11 = vld [vmem:[%s1111_s2 + $0x10] sm:$0xff]  ;;  %v52_v12 = vld [vmem:[%s1111_s2 + $0x20] sm:$0xff]  ;;  %v43_v13 = vld [vmem:[%s1110_s1 + $0x18] sm:$0xff] }
   0x6   :  { %v40_v14 = vld [vmem:[%s1110_s1] sm:$0xff]  ;;  %v51_v15 = vld [vmem:[%s1111_s2 + $0x18] sm:$0xff]  ;;  %v41_v16 = vld [vmem:[%s1110_s1 + $0x8] sm:$0xff] }
   0x7   :  { %v49_v17 = vld [vmem:[%s1111_s2 + $0x8] sm:$0xff]  ;;  %v48_v18 = vld [vmem:[%s1111_s2] sm:$0xff] }
   0x8   :  { %v39_v24 = vld [vmem:[%s1109_s0] sm:$0x7]  ;;  %s684_s0 = sshll.u32 %s778_s30, 4  ;;  %s685_s0 = int_to_ptr.vmem [resolvable:$true] %s684_s0 }
   0x9   :  { %v901_v25 = vperm.slane %v39_v24, 0  ;;  %v904_v30 = vperm.slane %v39_v24, 1  ;;  %v906_v32 = vperm.slane %v39_v24, 2  ;;  %v273_v24 = vld [vmem:[%s1113_s4 + $0x30] sm:$0xff] }
   0xa   :  { %728 = vset.pattern.permute.xlu0 %v776_v4 }
   0xb   :  { %725 = vset.pattern.permute.xlu1 %v775_v3  ;;  %137 = vperm.xlu2 %726, %v54_v5  }
   0xc   :  { %182 = vperm.xlu1 %725, %v47_v6   ;;  %93 = vperm.xlu0 %728, %v47_v6  }
  0x13   :  { %78 = vperm.xlu2 %726, %v44_v7  }
  0x14   :  { %729 = vset.pattern.permute.xlu1 %v777_v8  ;;  %88 = vperm.xlu0 %728, %v46_v1  }
  0x15   :  { %231 = vperm.xlu1 %729, %v47_v6  }
  0x1b   :  { %731 = vset.pattern.permute.xlu2 %v775_v3 }
  0x1c   :  { %174 = vperm.xlu2 %731, %v45_v2   ;;  %68 = vperm.xlu0 %728, %v42_v9  }
  0x1d   :  { %730 = vset.pattern.permute.xlu1 %v776_v4 }
  0x1e   :  { %132 = vperm.xlu1 %730, %v53_v10  }
  0x24   :  { %732 = vset.pattern.permute.xlu2 %v776_v4  ;;  %117 = vperm.xlu0 %728, %v50_v11  }
  0x25   :  { %127 = vperm.xlu2 %732, %v52_v12  }
  0x26   :  { %73 = vperm.xlu1 %730, %v43_v13  }
  0x2c   :  { %58 = vperm.xlu0 %728, %v40_v14  }
  0x2d   :  { %734 = vset.pattern.permute.xlu2 %v777_v8 }
  0x2e   :  { %733 = vset.pattern.permute.xlu1 %v775_v3  ;;  %223 = vperm.xlu2 %734, %v45_v2  }
  0x2f   :  { %170 = vperm.xlu1 %733, %v44_v7  }
  0x34   :  { %741 = vset.pattern.permute.xlu0 %v777_v8 }
  0x35   :  { %227 = vperm.xlu0 %741, %v46_v1  }
  0x36   :  { %736 = vset.pattern.permute.xlu2 %v775_v3 }
  0x37   :  { %735 = vset.pattern.permute.xlu1 %v776_v4  ;;  %166 = vperm.xlu2 %736, %v43_v13  }
  0x38   :  { %122 = vperm.xlu1 %735, %v51_v15  }
  0x3d   :  { %211 = vperm.xlu0 %741, %v42_v9  }
  0x3f   :  { %738 = vset.pattern.permute.xlu2 %v776_v4 }
  0x40   :  { %737 = vset.pattern.permute.xlu1 %v777_v8  ;;  %63 = vperm.xlu2 %738, %v41_v16  }
  0x41   :  { %219 = vperm.xlu1 %737, %v44_v7  }
  0x45   :  { %746 = vset.pattern.permute.xlu0 %v776_v4 }
  0x48   :  { %740 = vset.pattern.permute.xlu2 %v777_v8 }
  0x49   :  { %739 = vset.pattern.permute.xlu1 %v775_v3  ;;  %215 = vperm.xlu2 %740, %v43_v13  }
  0x4a   :  { %162 = vperm.xlu1 %739, %v42_v9  }
  0x51   :  { %743 = vset.pattern.permute.xlu2 %v775_v3 }
  0x52   :  { %742 = vset.pattern.permute.xlu1 %v776_v4  ;;  %158 = vperm.xlu2 %743, %v41_v16  }
  0x53   :  { %112 = vperm.xlu1 %742, %v49_v17  }
  0x5a   :  { %154 = vperm.xlu2 %743, %v40_v14  }
  0x5b   :  { %107 = vperm.xlu1 %742, %v48_v18  }
  0x5d   :  { %v84_v19 = vpop.permute.xlu2 %83 }
  0x5e   :  { %v102_v48 = vmul.f32 %v901_v25, %v84_v19 }
  0x62   :  { %745 = vset.pattern.permute.xlu2 %v777_v8 }
  0x63   :  { %744 = vset.pattern.permute.xlu1 %v777_v8  ;;  %203 = vperm.xlu2 %745, %v40_v14  }
  0x64   :  { %207 = vperm.xlu1 %744, %v41_v16  }
  0x65   :  { %v138_v20 = vpop.permute.xlu2 %137 }
  0x6b   :  { %748 = vset.pattern.permute.xlu2 %v776_v4 }
  0x6c   :  { %747 = vset.pattern.permute.xlu1 %v776_v4 }
  0x6d   :  { %v79_v23 = vpop.permute.xlu2 %78  ;;  %307 = vperm.xlu1 %747, %v273_v24  }
  0x6e   :  { %v101_v6 = vmul.f32 %v901_v25, %v79_v23 }
  0x74   :  { %v179_v21 = vpop.permute.xlu0 %178 }
  0x75   :  { %v143_v22 = vpop.permute.xlu1 %142  ;;  %v192_v53 = vmul.f32 %v904_v30, %v179_v21 }
  0x76   :  { %v175_v29 = vpop.permute.xlu2 %174 }
  0x77   :  { %v191_v51 = vmul.f32 %v904_v30, %v175_v29 }
  0x7e   :  { %v183_v26 = vpop.permute.xlu1 %182  ;;  %v94_v27 = vpop.permute.xlu0 %93 }
  0x7f   :  { %v104_v28 = vmul.f32 %v901_v25, %v94_v27  ;;  %v193_v33 = vmul.f32 %v904_v30, %v183_v26  ;;  %v128_v39 = vpop.permute.xlu2 %127 }
  0x80   :  { %v149_v8 = vadd.f32 %v128_v39, %v101_v6  ;;  %v272_v39 = vld [vmem:[%s1113_s4 + $0x28] sm:$0xff]  ;;  %v648_v6 = vld [vmem:[%s1119_s10] sm:$0x3] }
  0x81   :  { %v152_v31 = vadd.f32 %v143_v22, %v104_v28  ;;  %302 = vperm.xlu2 %748, %v272_v39  }
  0x83   :  { %v201_v37 = vadd.f32 %v193_v33, %v152_v31  ;;  %v271_v31 = vld [vmem:[%s1113_s4 + $0x20] sm:$0xff] }
  0x84   :  { %297 = vperm.xlu1 %747, %v271_v31  }
  0x86   :  { %v89_v34 = vpop.permute.xlu0 %88 }
  0x87   :  { %v232_v35 = vpop.permute.xlu1 %231  ;;  %v103_v49 = vmul.f32 %v901_v25, %v89_v34 }
  0x88   :  { %v242_v36 = vmul.f32 %v906_v32, %v232_v35  ;;  %v224_v43 = vpop.permute.xlu2 %223  ;;  %v274_v35 = vld [vmem:[%s1113_s4 + $0x38] sm:$0xff] }
  0x89   :  { %v151_v54 = vadd.f32 %v138_v20, %v103_v49  ;;  %v240_v57 = vmul.f32 %v906_v32, %v224_v43  ;;  %312 = vperm.xlu0 %746, %v274_v35  }
  0x8a   :  { %v250_v38 = vadd.f32 %v242_v36, %v201_v37  ;;  %v268_v36 = vld [vmem:[%s1113_s4 + $0x8] sm:$0xff] }
  0x8b   :  { %v200_v60 = vadd.f32 %v192_v53, %v151_v54 }
  0x8c   :  { %v258_v40 = vmax.f32 %v250_v38, 0.0  ;;  %282 = vperm.xlu1 %747, %v268_v36  }
  0x8e   :  { %348 = vmatpush.msra.mxu0 %v258_v40  ;;  %v69_v41 = vpop.permute.xlu0 %68  ;;  %v269_v40 = vld [vmem:[%s1113_s4 + $0x10] sm:$0xff] }
  0x8f   :  { %v99_v17 = vmul.f32 %v901_v25, %v69_v41 }
  0x90   :  { %v133_v42 = vpop.permute.xlu1 %132 }
  0x91   :  { %v167_v46 = vpop.permute.xlu2 %166  ;;  %v150_v52 = vadd.f32 %v133_v42, %v102_v48  ;;  %287 = vperm.xlu0 %746, %v269_v40  }
  0x92   :  { %v189_v2 = vmul.f32 %v904_v30, %v167_v46 }
  0x93   :  { %v199_v56 = vadd.f32 %v191_v51, %v150_v52  ;;  %v270_v52 = vld [vmem:[%s1113_s4 + $0x18] sm:$0xff] }
  0x94   :  { %292 = vperm.xlu2 %748, %v270_v52   ;;  %v391_v52 = vld [vmem:[%s1114_s5 + $0x10] sm:$0xff] }
  0x95   :  { %v248_v63 = vadd.f32 %v240_v57, %v199_v56  ;;  %v400_v56 = vld [vmem:[%s1115_s6 + $0x18] sm:$0xff] }
  0x96   :  { %v118_v44 = vpop.permute.xlu0 %117 }
  0x97   :  { %v256_v4 = vmax.f32 %v248_v63, 0.0  ;;  %v147_v21 = vadd.f32 %v118_v44, %v99_v17  ;;  %v531_v63 = vld [vmem:[%s1117_s8 + $0x28] sm:$0xff] }
  0x98   :  { %v74_v45 = vpop.permute.xlu1 %73 }
  0x99   :  { %v100_v0 = vmul.f32 %v901_v25, %v74_v45 }
  0x9a   :  { %v64_v55 = vpop.permute.xlu2 %63 }
  0x9b   :  { %v98_v41 = vmul.f32 %v901_v25, %v64_v55 }
  0x9e   :  { %v59_v47 = vpop.permute.xlu0 %58 }
  0x9f   :  { %v97_v38 = vmul.f32 %v901_v25, %v59_v47  ;;  %v403_v47 = vld [vmem:[%s1115_s6 + $0x30] sm:$0xff] }
  0xa0   :  { %437 = vperm.xlu1 %747, %v403_v47  }
  0xa1   :  { %v171_v50 = vpop.permute.xlu1 %170 }
  0xa2   :  { %v190_v7 = vmul.f32 %v904_v30, %v171_v50 }
  0xa3   :  { %v216_v5 = vpop.permute.xlu2 %215 }
  0xa4   :  { %v238_v10 = vmul.f32 %v906_v32, %v216_v5  ;;  %v198_v12 = vadd.f32 %v190_v7, %v149_v8  ;;  %v529_v5 = vld [vmem:[%s1117_s8 + $0x18] sm:$0xff]  ;;  %v263_v7 = vld [vmem:[%s1112_s3 + $0x20] sm:$0xff]  ;;  %v399_v8 = vld [vmem:[%s1115_s6 + $0x10] sm:$0xff] }
  0xa7   :  { %v228_v58 = vpop.permute.xlu0 %227 }
  0xa8   :  { %v241_v59 = vmul.f32 %v906_v32, %v228_v58  ;;  %422 = vperm.xlu1 %747, %v400_v56   ;;  %v267_v58 = vld [vmem:[%s1113_s4] sm:$0xff]  ;;  %v396_v56 = vld [vmem:[%s1114_s5 + $0x38] sm:$0xff] }
  0xa9   :  { %277 = vperm.xlu2 %748, %v267_v58  }
  0xaa   :  { %v123_v61 = vpop.permute.xlu1 %122  ;;  %v249_v62 = vadd.f32 %v241_v59, %v200_v60  ;;  %v401_v59 = vld [vmem:[%s1115_s6 + $0x20] sm:$0xff] }
  0xab   :  { %v148_v3 = vadd.f32 %v123_v61, %v100_v0  ;;  %v397_v60 = vld [vmem:[%s1115_s6] sm:$0xff]  ;;  %v260_v61 = vld [vmem:[%s1112_s3 + $0x8] sm:$0xff]  ;;  %v261_v0 = vld [vmem:[%s1112_s3 + $0x10] sm:$0xff] }
  0xac   :  { %v257_v1 = vmax.f32 %v249_v62, 0.0  ;;  %v159_v26 = vpop.permute.xlu2 %158  ;;  %v398_v62 = vld [vmem:[%s1115_s6 + $0x8] sm:$0xff] }
  0xad   :  { %v197_v9 = vadd.f32 %v189_v2, %v148_v3  ;;  %v187_v44 = vmul.f32 %v904_v30, %v159_v26  ;;  %v528_v2 = vld [vmem:[%s1117_s8 + $0x10] sm:$0xff]  ;;  %v262_v3 = vld [vmem:[%s1112_s3 + $0x18] sm:$0xff] }
  0xae   :  { %349 = vmatpush.msra.mxu0 %v257_v1  ;;  %v532_v1 = vld [vmem:[%s1117_s8 + $0x30] sm:$0xff] }
  0xaf   :  { %v246_v15 = vadd.f32 %v238_v10, %v197_v9  ;;  %v212_v19 = vpop.permute.xlu0 %211  ;;  %v526_v9 = vld [vmem:[%s1117_s8] sm:$0xff]  ;;  %v264_v10 = vld [vmem:[%s1112_s3 + $0x28] sm:$0xff] }
  0xb0   :  { %350 = vmatpush.msra.mxu0 %v256_v4  ;;  %v237_v23 = vmul.f32 %v906_v32, %v212_v19  ;;  %407 = vperm.xlu1 %747, %v397_v60   ;;  %v402_v4 = vld [vmem:[%s1115_s6 + $0x28] sm:$0xff] }
  0xb1   :  { %v254_v18 = vmax.f32 %v246_v15, 0.0  ;;  %432 = vperm.xlu2 %748, %v402_v4   ;;  %v527_v15 = vld [vmem:[%s1117_s8 + $0x8] sm:$0xff] }
  0xb3   :  { %v220_v11 = vpop.permute.xlu1 %219 }
  0xb4   :  { %v239_v13 = vmul.f32 %v906_v32, %v220_v11  ;;  %v155_v34 = vpop.permute.xlu2 %154  ;;  %v533_v11 = vld [vmem:[%s1117_s8 + $0x38] sm:$0xff] }
  0xb5   :  { %v186_v46 = vmul.f32 %v904_v30, %v155_v34 }
  0xb6   :  { %v247_v14 = vadd.f32 %v239_v13, %v198_v12  ;;  %v265_v12 = vld [vmem:[%s1112_s3 + $0x30] sm:$0xff]  ;;  %v530_v13 = vld [vmem:[%s1117_s8 + $0x20] sm:$0xff] }
  0xb8   :  { %v255_v16 = vmax.f32 %v247_v14, 0.0  ;;  %561 = vperm.xlu1 %747, %v531_v63   ;;  %v266_v14 = vld [vmem:[%s1112_s3 + $0x38] sm:$0xff] }
  0xb9   :  { %417 = vperm.xlu2 %748, %v399_v8  }
  0xba   :  { %351 = vmatpush.msra.mxu0 %v255_v16 }
  0xbc   :  { %v163_v20 = vpop.permute.xlu1 %162  ;;  %352 = vmatpush.msra.mxu0 %v254_v18 }
  0xbd   :  { %v188_v22 = vmul.f32 %v904_v30, %v163_v20  ;;  %v204_v43 = vpop.permute.xlu2 %203  ;;  %v404_v30 = vld [vmem:[%s1115_s6 + $0x38] sm:$0xff] }
  0xbe   :  { %v235_v49 = vmul.f32 %v906_v32, %v204_v43  ;;  %442 = vperm.xlu0 %746, %v404_v30   ;;  %v392_v30 = vld [vmem:[%s1114_s5 + $0x18] sm:$0xff] }
  0xbf   :  { %v196_v27 = vadd.f32 %v188_v22, %v147_v21 }
  0xc0   :  { %546 = vperm.xlu1 %747, %v528_v2  }
  0xc1   :  { %v245_v28 = vadd.f32 %v237_v23, %v196_v27  ;;  %571 = vperm.xlu2 %748, %v533_v11  }
  0xc3   :  { %v253_v29 = vmax.f32 %v245_v28, 0.0 }
  0xc5   :  { %v113_v33 = vpop.permute.xlu1 %112  ;;  %353 = vmatpush.msra.mxu0 %v253_v29 }
  0xc6   :  { %v146_v45 = vadd.f32 %v113_v33, %v98_v41  ;;  %427 = vperm.xlu0 %746, %v401_v59  }
  0xc8   :  { %v195_v51 = vadd.f32 %v187_v44, %v146_v45  ;;  %651 = vperm.xlu1 %747, %v648_v6  }
  0xc9   :  { %556 = vperm.xlu2 %748, %v530_v13  }
  0xcd   :  { %v108_v37 = vpop.permute.xlu1 %107 }
  0xce   :  { %v145_v42 = vadd.f32 %v108_v37, %v97_v38  ;;  %412 = vperm.xlu0 %746, %v398_v62  }
  0xd0   :  { %v194_v48 = vadd.f32 %v186_v46, %v145_v42 }
  0xd1   :  { %541 = vperm.xlu2 %748, %v527_v15  }
  0xd2   :  { %v243_v54 = vadd.f32 %v235_v49, %v194_v48 }
  0xd4   :  { %v251_v57 = vmax.f32 %v243_v54, 0.0  ;;  %v394_v54 = vld [vmem:[%s1114_s5 + $0x28] sm:$0xff] }
  0xd6   :  { %v208_v50 = vpop.permute.xlu1 %207  ;;  %566 = vperm.xlu0 %746, %v532_v1  }
  0xd7   :  { %v236_v25 = vmul.f32 %v906_v32, %v208_v50  ;;  %v259_v32 = vld [vmem:[%s1112_s3] sm:$0xff] }
  0xd9   :  { %v244_v53 = vadd.f32 %v236_v25, %v195_v51  ;;  %v389_v51 = vld [vmem:[%s1114_s5] sm:$0xff]  ;;  %v390_v25 = vld [vmem:[%s1114_s5 + $0x8] sm:$0xff] }
  0xdb   :  { %v252_v55 = vmax.f32 %v244_v53, 0.0  ;;  %v303_v22 = vpop.permute.xlu2 %302  ;;  %v393_v53 = vld [vmem:[%s1114_s5 + $0x20] sm:$0xff] }
  0xdd   :  { %354 = vmatpush.msra.mxu0 %v252_v55  ;;  %v395_v55 = vld [vmem:[%s1114_s5 + $0x30] sm:$0xff] }
  0xde   :  { %551 = vperm.xlu0 %746, %v529_v5  }
  0xdf   :  { %355 = vmatpush.msra.mxu0 %v251_v57  ;;  %v308_v23 = vpop.permute.xlu1 %307 }
  0xe0   :  { %695 = vmatmul.msk.f32.vlgmr.msra.gmra.mxu0 %vm315_vm0, %v259_v32 }
  0xe6   :  { %536 = vperm.xlu0 %746, %v526_v9  }
  0xe8   :  { %696 = vmatmul.msk.f32.gmra.mxu0 %vm315_vm0, %v260_v61 }
  0xee   :  { %v293_v27 = vpop.permute.xlu2 %292 }
  0xf0   :  { %697 = vmatmul.msk.f32.gmra.mxu0 %vm315_vm0, %v261_v0 }
  0xf6   :  { %v298_v28 = vpop.permute.xlu1 %297 }
  0xf8   :  { %698 = vmatmul.msk.f32.gmra.mxu0 %vm315_vm0, %v262_v3 }
  0xfb   :  { %v313_v26 = vpop.permute.xlu0 %312 }
  0xfe   :  { %v283_v44 = vpop.permute.xlu1 %282 }
 0x100   :  { %699 = vmatmul.msk.f32.gmra.mxu0 %vm315_vm0, %v263_v7 }
 0x103   :  { %v288_v40 = vpop.permute.xlu0 %287  ;;  %v278_v43 = vpop.permute.xlu2 %277 }
 0x108   :  { %700 = vmatmul.msk.f32.gmra.mxu0 %vm315_vm0, %v264_v10 }
 0x10b   :  { %v433_v1 = vpop.permute.xlu2 %432 }
 0x110   :  { %701 = vmatmul.msk.f32.gmra.mxu0 %vm315_vm0, %v265_v12 }
 0x112   :  { %v438_v63 = vpop.permute.xlu1 %437 }
 0x113   :  { %v418_v13 = vpop.permute.xlu2 %417 }
 0x118   :  { %702 = vmatmul.msk.f32.gmra.mxu0 %vm315_vm0, %v266_v14 }
 0x11a   :  { %v423_v6 = vpop.permute.xlu1 %422 }
 0x130   :  { %v443_v62 = vpop.permute.xlu0 %442 }
 0x138   :  { %v428_v2 = vpop.permute.xlu0 %427 }
 0x15d   :  { %v357_v16 = vpop.f32.mrf.mxu0 }
 0x15e   :  { %v358_v47 = vadd.f32 %v357_v16, %v278_v43  ;;  %v413_v16 = vpop.permute.xlu0 %412 }
 0x160   :  { %v381_v50 = vmax.f32 %v358_v47, 0.0 }
 0x165   :  { %v360_v17 = vpop.f32.mrf.mxu0 }
 0x166   :  { %v361_v45 = vadd.f32 %v360_v17, %v283_v44 }
 0x168   :  { %v382_v49 = vmax.f32 %v361_v45, 0.0 }
 0x16d   :  { %v363_v18 = vpop.f32.mrf.mxu0 }
 0x16e   :  { %v364_v41 = vadd.f32 %v363_v18, %v288_v40 }
 0x170   :  { %v383_v48 = vmax.f32 %v364_v41, 0.0  ;;  %v572_v41 = vpop.permute.xlu2 %571 }
 0x175   :  { %v366_v19 = vpop.f32.mrf.mxu0 }
 0x176   :  { %v367_v38 = vadd.f32 %v366_v19, %v293_v27  ;;  %v408_v19 = vpop.permute.xlu1 %407  ;;  %v520_v27 = vld [vmem:[%s1116_s7 + $0x10] sm:$0xff] }
 0x178   :  { %v384_v46 = vmax.f32 %v367_v38, 0.0  ;;  %v557_v45 = vpop.permute.xlu2 %556 }
 0x17d   :  { %v369_v20 = vpop.f32.mrf.mxu0 }
 0x17e   :  { %v370_v36 = vadd.f32 %v369_v20, %v298_v28  ;;  %v521_v28 = vld [vmem:[%s1116_s7 + $0x18] sm:$0xff]  ;;  %v562_v44 = vpop.permute.xlu1 %561 }
 0x180   :  { %v385_v42 = vmax.f32 %v370_v36, 0.0 }
 0x185   :  { %v372_v21 = vpop.f32.mrf.mxu0 }
 0x186   :  { %v373_v34 = vadd.f32 %v372_v21, %v303_v22 }
 0x188   :  { %v386_v39 = vmax.f32 %v373_v34, 0.0  ;;  %v525_v34 = vld [vmem:[%s1116_s7 + $0x38] sm:$0xff] }
 0x18d   :  { %v375_v24 = vpop.f32.mrf.mxu0 }
 0x18e   :  { %v376_v31 = vadd.f32 %v375_v24, %v308_v23  ;;  %v518_v24 = vld [vmem:[%s1116_s7] sm:$0xff] }
 0x190   :  { %v387_v37 = vmax.f32 %v376_v31, 0.0  ;;  %v523_v31 = vld [vmem:[%s1116_s7 + $0x28] sm:$0xff] }
 0x195   :  { %v378_v29 = vpop.f32.mrf.mxu0 }
 0x196   :  { %v379_v33 = vadd.f32 %v378_v29, %v313_v26  ;;  %v519_v26 = vld [vmem:[%s1116_s7 + $0x8] sm:$0xff]  ;;  %v522_v29 = vld [vmem:[%s1116_s7 + $0x20] sm:$0xff] }
 0x198   :  { %v388_v35 = vmax.f32 %v379_v33, 0.0  ;;  %v524_v33 = vld [vmem:[%s1116_s7 + $0x30] sm:$0xff] }
 0x19a   :  { %477 = vmatpush.msra.mxu1 %v388_v35 }
 0x19c   :  { %478 = vmatpush.msra.mxu1 %v387_v37 }
 0x19e   :  { %479 = vmatpush.msra.mxu1 %v386_v39 }
 0x1a0   :  { %480 = vmatpush.msra.mxu1 %v385_v42  ;;  %v567_v42 = vpop.permute.xlu0 %566 }
 0x1a2   :  { %481 = vmatpush.msra.mxu1 %v384_v46 }
 0x1a4   :  { %482 = vmatpush.msra.mxu1 %v383_v48 }
 0x1a6   :  { %483 = vmatpush.msra.mxu1 %v382_v49 }
 0x1a8   :  { %484 = vmatpush.msra.mxu1 %v381_v50  ;;  %v552_v49 = vpop.permute.xlu0 %551 }
 0x1a9   :  { %703 = vmatmul.msk.f32.vlgmr.msra.gmra.mxu1 %vm315_vm0, %v389_v51 }
 0x1b1   :  { %704 = vmatmul.msk.f32.gmra.mxu1 %vm315_vm0, %v390_v25 }
 0x1b9   :  { %705 = vmatmul.msk.f32.gmra.mxu1 %vm315_vm0, %v391_v52 }
 0x1c1   :  { %706 = vmatmul.msk.f32.gmra.mxu1 %vm315_vm0, %v392_v30 }
 0x1c9   :  { %707 = vmatmul.msk.f32.gmra.mxu1 %vm315_vm0, %v393_v53 }
 0x1d1   :  { %708 = vmatmul.msk.f32.gmra.mxu1 %vm315_vm0, %v394_v54  ;;  %v547_v54 = vpop.permute.xlu1 %546 }
 0x1d9   :  { %709 = vmatmul.msk.f32.gmra.mxu1 %vm315_vm0, %v395_v55 }
 0x1e1   :  { %710 = vmatmul.msk.f32.gmra.mxu1 %vm315_vm0, %v396_v56 }
 0x226   :  { %v486_v57 = vpop.f32.mrf.mxu1 }
 0x227   :  { %v487_v20 = vadd.f32 %v486_v57, %v408_v19  ;;  %v542_v57 = vpop.permute.xlu2 %541 }
 0x229   :  { %v510_v23 = vmax.f32 %v487_v20, 0.0 }
 0x22e   :  { %v489_v32 = vpop.f32.mrf.mxu1 }
 0x22f   :  { %v490_v17 = vadd.f32 %v489_v32, %v413_v16 }
 0x231   :  { %v511_v22 = vmax.f32 %v490_v17, 0.0 }
 0x236   :  { %v492_v58 = vpop.f32.mrf.mxu1 }
 0x237   :  { %v493_v14 = vadd.f32 %v492_v58, %v418_v13 }
 0x239   :  { %v512_v21 = vmax.f32 %v493_v14, 0.0 }
 0x23e   :  { %v495_v59 = vpop.f32.mrf.mxu1 }
 0x23f   :  { %v496_v11 = vadd.f32 %v495_v59, %v423_v6  ;;  %v537_v59 = vpop.permute.xlu0 %536 }
 0x241   :  { %v513_v18 = vmax.f32 %v496_v11, 0.0 }
 0x246   :  { %v498_v60 = vpop.f32.mrf.mxu1 }
 0x247   :  { %v499_v9 = vadd.f32 %v498_v60, %v428_v2 }
 0x249   :  { %v514_v15 = vmax.f32 %v499_v9, 0.0 }
 0x24e   :  { %v501_v61 = vpop.f32.mrf.mxu1 }
 0x24f   :  { %v502_v7 = vadd.f32 %v501_v61, %v433_v1  ;;  %v652_v1 = vpop.permute.xlu1 %651 }
 0x251   :  { %v515_v12 = vmax.f32 %v502_v7, 0.0 }
 0x256   :  { %v504_v0 = vpop.f32.mrf.mxu1 }
 0x257   :  { %v505_v4 = vadd.f32 %v504_v0, %v438_v63  ;;  %v647_v0 = vld [vmem:[%s1118_s9] sm:$0x3] }
 0x259   :  { %v516_v10 = vmax.f32 %v505_v4, 0.0 }
 0x25e   :  { %v507_v3 = vpop.f32.mrf.mxu1 }
 0x25f   :  { %v508_v5 = vadd.f32 %v507_v3, %v443_v62 }
 0x261   :  { %v517_v8 = vmax.f32 %v508_v5, 0.0 }
 0x263   :  { %606 = vmatpush.msra.mxu2 %v517_v8 }
 0x265   :  { %607 = vmatpush.msra.mxu2 %v516_v10 }
 0x267   :  { %608 = vmatpush.msra.mxu2 %v515_v12 }
 0x269   :  { %609 = vmatpush.msra.mxu2 %v514_v15 }
 0x26b   :  { %610 = vmatpush.msra.mxu2 %v513_v18 }
 0x26d   :  { %611 = vmatpush.msra.mxu2 %v512_v21 }
 0x26f   :  { %612 = vmatpush.msra.mxu2 %v511_v22 }
 0x271   :  { %613 = vmatpush.msra.mxu2 %v510_v23 }
 0x272   :  { %711 = vmatmul.msk.f32.vlgmr.msra.gmra.mxu2 %vm315_vm0, %v518_v24 }
 0x27a   :  { %712 = vmatmul.msk.f32.gmra.mxu2 %vm315_vm0, %v519_v26 }
 0x282   :  { %713 = vmatmul.msk.f32.gmra.mxu2 %vm315_vm0, %v520_v27 }
 0x28a   :  { %714 = vmatmul.msk.f32.gmra.mxu2 %vm315_vm0, %v521_v28 }
 0x292   :  { %715 = vmatmul.msk.f32.gmra.mxu2 %vm315_vm0, %v522_v29 }
 0x29a   :  { %716 = vmatmul.msk.f32.gmra.mxu2 %vm315_vm0, %v523_v31 }
 0x2a2   :  { %717 = vmatmul.msk.f32.gmra.mxu2 %vm315_vm0, %v524_v33 }
 0x2aa   :  { %718 = vmatmul.msk.f32.gmra.mxu2 %vm315_vm0, %v525_v34 }
 0x2f5   :  { %v615_v35 = vpop.f32.mrf.mxu2 }
 0x2f6   :  { %v616_v60 = vadd.f32 %v615_v35, %v537_v59 }
 0x2f8   :  { %v639_v63 = vmax.f32 %v616_v60, 0.0 }
 0x2fd   :  { %v618_v36 = vpop.f32.mrf.mxu2 }
 0x2fe   :  { %v619_v32 = vadd.f32 %v618_v36, %v542_v57 }
 0x300   :  { %v640_v62 = vmax.f32 %v619_v32, 0.0 }
 0x305   :  { %v621_v37 = vpop.f32.mrf.mxu2 }
 0x306   :  { %v622_v55 = vadd.f32 %v621_v37, %v547_v54 }
 0x308   :  { %v641_v61 = vmax.f32 %v622_v55, 0.0 }
 0x30d   :  { %v624_v38 = vpop.f32.mrf.mxu2 }
 0x30e   :  { %v625_v30 = vadd.f32 %v624_v38, %v552_v49 }
 0x310   :  { %v642_v58 = vmax.f32 %v625_v30, 0.0 }
 0x315   :  { %v627_v39 = vpop.f32.mrf.mxu2 }
 0x316   :  { %v628_v25 = vadd.f32 %v627_v39, %v557_v45 }
 0x318   :  { %v643_v56 = vmax.f32 %v628_v25, 0.0 }
 0x31d   :  { %v630_v40 = vpop.f32.mrf.mxu2 }
 0x31e   :  { %v631_v50 = vadd.f32 %v630_v40, %v562_v44 }
 0x320   :  { %v644_v53 = vmax.f32 %v631_v50, 0.0 }
 0x325   :  { %v633_v43 = vpop.f32.mrf.mxu2 }
 0x326   :  { %v634_v47 = vadd.f32 %v633_v43, %v567_v42 }
 0x328   :  { %v645_v52 = vmax.f32 %v634_v47, 0.0 }
 0x32d   :  { %v636_v46 = vpop.f32.mrf.mxu2 }
 0x32e   :  { %v637_v48 = vadd.f32 %v636_v46, %v572_v41 }
 0x330   :  { %v646_v51 = vmax.f32 %v637_v48, 0.0 }
 0x332   :  { %665 = vmatpush.msra.mxu3 %v646_v51 }
 0x334   :  { %666 = vmatpush.msra.mxu3 %v645_v52 }
 0x336   :  { %667 = vmatpush.msra.mxu3 %v644_v53 }
 0x338   :  { %668 = vmatpush.msra.mxu3 %v643_v56 }
 0x33a   :  { %669 = vmatpush.msra.mxu3 %v642_v58 }
 0x33c   :  { %670 = vmatpush.msra.mxu3 %v641_v61 }
 0x33e   :  { %671 = vmatpush.msra.mxu3 %v640_v62 }
 0x340   :  { %672 = vmatpush.msra.mxu3 %v639_v63 }
 0x341   :  { %719 = vmatmul.msk.f32.vlgmr.msra.gmra.mxu3 %vm315_vm0, %v647_v0 }
 0x3c4   :  { %v674_v2 = vpop.f32.mrf.mxu3 }
 0x3c5   :  { %v675_v3 = vadd.f32 %v674_v2, %v652_v1 }
 0x3c7   :  { %678 = vst.msk [vmem:[#allocation2] sm:$0x3] %vm677_vm1, %v675_v3 }
 0x3c8   :  { %689 = dma.vmem_to_hbm [thread:$0]  %s685_s0, 32, %s687_s13, [#allocation3]  }
 0x3c9   :  { %773 = dma.done.wait [#allocation3], 32  }
 0x3ca   :  { %774 = vsyncadd [#allocation3], 4294967264 }
 0x3cb   :  { %694 = vsyncpa [#allocation3], 1 }

</bundles_post_ra>
